<compile_context>
chip_gen: v6e
topology: v6e:2x2x1
jax: 0.10.0
libtpu: 0.0.40
codegen_flags: <defaults>
</compile_context>

<pallas_src>
import functools
import math

import jax
import jax.numpy as jnp
from jax.experimental import pallas as pl
from jax.experimental.pallas import tpu as pltpu

IN_FEATURES = 7647
OUT_FEATURES = 1
_LANES = 128
_SUBLANES = 8
_F_PHYS = ((IN_FEATURES + _LANES - 1) // _LANES) * _LANES  # 7680: physical lane pad in VMEM
_CHUNK = 1024  # 128-aligned feature chunk for the multiply+reduce


def _round_up(x, m):
    return (x + m - 1) // m * m


def bow_kernel(x_ref, w_ref, b_ref, o_ref):
    # x_ref: (TB, 7647) f32  -- pipelined HBM->VMEM per grid step
    # w_ref: (1, 7647)  f32  -- lane-major, VMEM-resident (constant index_map)
    # b_ref: (1, 1)     f32  -- SMEM scalar
    # o_ref: (TB, 1)    f32
    tb, f = x_ref.shape
    acc = jnp.zeros((tb, 1), jnp.float32)
    # Chunked VPU multiply + XLU lane reduce: bounds the product temporary to
    # (TB, _CHUNK) instead of materializing the full (TB, 7647) product; the
    # acc data dependence serializes chunks, so vreg/VMEM pressure stays low.
    for lo in range(0, f, _CHUNK):
        hi = min(lo + _CHUNK, f)
        acc = acc + jnp.sum(x_ref[:, lo:hi] * w_ref[:, lo:hi],
                            axis=-1, keepdims=True)
    o_ref[...] = jax.nn.sigmoid(acc + b_ref[0, 0]).astype(o_ref.dtype)
    # TODO(synk): if profiling shows a wall-minus-compute gap, emit a
    # lane-dense (1, TB) output per tile instead of the (TB, 1) column.


@functools.partial(jax.jit, static_argnames=("tb",))
def bow_forward(x, w, b, *, tb=512):
    """x: (B, 7647) f32, w: (7647, 1) f32, b: (1,) f32 -> (B, 1) f32."""
    B = x.shape[0]

    # Tiny reshapes only (30 KB weight / scalar bias). x reaches the kernel
    # untouched, so the only HBM traffic for the activation is the kernel DMA.
    w_row = w.reshape(1, IN_FEATURES)
    b2d = b.reshape(1, 1)

    # Batch tile: multiple of 8 sublanes, capped at `tb`. Prefer >= 2 grid
    # steps so the "parallel" axis can use both TensorCores on megacore chips.
    TB = min(tb, _round_up(B, _SUBLANES))
    if B > _SUBLANES and pl.cdiv(B, TB) < 2:
        TB = _round_up(pl.cdiv(B, 2), _SUBLANES)
    grid = (pl.cdiv(B, TB),)

    # VMEM budget: 2x double-buffered x tile (physically lane-padded to 7680)
    # + 2x weight buffer (occupies 8 sublanes physically) + 2x lane-padded
    # output buffer + chunked multiply temporaries + headroom.
    vmem_bytes = (2 * TB * _F_PHYS * 4
                  + 2 * _SUBLANES * _F_PHYS * 4
                  + 2 * TB * _LANES * 4
                  + 2 * TB * _CHUNK * 4
                  + (4 << 20))

    return pl.pallas_call(
        bow_kernel,
        out_shape=jax.ShapeDtypeStruct((B, OUT_FEATURES), jnp.float32),
        grid_spec=pltpu.PrefetchScalarGridSpec(
            num_scalar_prefetch=0,
            grid=grid,
            in_specs=[
                # Full-extent feature block: no feature padding, no extra copy.
                pl.BlockSpec((TB, IN_FEATURES), lambda i: (i, 0)),
                # Weight: constant index_map -> fetched once, stays resident.
                pl.BlockSpec((1, IN_FEATURES), lambda i: (0, 0)),
                # Bias scalar in SMEM.
                pl.BlockSpec(memory_space=pltpu.SMEM),
            ],
            out_specs=pl.BlockSpec((TB, OUT_FEATURES), lambda i: (i, 0)),
        ),
        compiler_params=pltpu.CompilerParams(
            dimension_semantics=("parallel",),  # megacore-sharded on v7x
            vmem_limit_bytes=int(vmem_bytes),
        ),
    )(x, w_row, b2d)


def reference_forward(x, w, b):
    return jax.nn.sigmoid(
        jnp.dot(x, w, precision=jax.lax.Precision.HIGHEST) + b[None, :]
    )


if __name__ == "__main__":
    key = jax.random.PRNGKey(0)
    k_x, k_w, k_b = jax.random.split(key, 3)

    # Deterministic synthetic parameters (mimicking torch Linear init bounds).
    bound = 1.0 / math.sqrt(IN_FEATURES)
    w = jax.random.uniform(k_w, (IN_FEATURES, OUT_FEATURES),
                           minval=-bound, maxval=bound, dtype=jnp.float32)
    b = jax.random.uniform(k_b, (OUT_FEATURES,),
                           minval=-bound, maxval=bound, dtype=jnp.float32)

    # Case 1: small batch (B=10) -> TB=8, 2 grid steps, last block rows 10..15
    # clamped by Pallas (no padding, no output slicing).
    x1 = jax.random.normal(k_x, (10, IN_FEATURES), dtype=jnp.float32)
    out1 = jax.block_until_ready(bow_forward(x1, w, b))
    assert out1.shape == (10, OUT_FEATURES)
    assert jnp.allclose(out1, reference_forward(x1, w, b), atol=2e-5, rtol=1e-5)

    # Case 2: multi-step pipelined grid with a partial last block
    # (B=43, tb=16 -> grid of 3; resident weight reused every step).
    x2 = jax.random.normal(jax.random.PRNGKey(1), (43, IN_FEATURES), dtype=jnp.float32)
    out2 = jax.block_until_ready(bow_forward(x2, w, b, tb=16))
    assert out2.shape == (43, OUT_FEATURES)
    assert jnp.allclose(out2, reference_forward(x2, w, b), atol=2e-5, rtol=1e-5)

    print("KERNEL_OK")
</pallas_src>

<mosaic_0001>
module attributes {stable_mosaic.version = 11 : i64} {
  func.func @bow_kernel(%arg0: i32, %arg1: memref<8x7647xf32, #tpu.memory_space<vmem>>, %arg2: memref<1x7647xf32, #tpu.memory_space<vmem>>, %arg3: memref<1x1xf32, #tpu.memory_space<smem>>, %arg4: memref<8x1xf32, #tpu.memory_space<vmem>>) attributes {dimension_semantics = [#tpu.dimension_semantics<parallel>], iteration_bounds = array<i64: 2>, scalar_prefetch = 0 : i64, scratch_operands = 0 : i64, tpu.core_type = #tpu.core_type<tc>, window_params = [{transform_indices = @transform_0, window_bounds = array<i64: 8, 7647>}, {pipeline_mode = #tpu.pipeline_mode<synchronous>, transform_indices = @transform_1, window_bounds = array<i64: 1, 7647>}, {transform_indices = @transform_2, window_bounds = array<i64: 1, 1>}, {transform_indices = @transform_3, window_bounds = array<i64: 8, 1>}]} {
    %cst = arith.constant 0.000000e+00 : f32
    %0 = vector.broadcast %cst : f32 to vector<8x1xf32>
    %c0 = arith.constant 0 : index
    %c0_0 = arith.constant 0 : index
    %1 = vector.load %arg1[%c0, %c0_0] : memref<8x7647xf32, #tpu.memory_space<vmem>>, vector<8x1024xf32>
    %c0_1 = arith.constant 0 : index
    %c0_2 = arith.constant 0 : index
    %2 = vector.load %arg2[%c0_1, %c0_2] : memref<1x7647xf32, #tpu.memory_space<vmem>>, vector<1x1024xf32>
    %3 = vector.broadcast %2 : vector<1x1024xf32> to vector<8x1024xf32>
    %4 = arith.mulf %1, %3 : vector<8x1024xf32>
    %cst_3 = arith.constant dense<0.000000e+00> : vector<8xf32>
    %5 = vector.multi_reduction <add>, %4, %cst_3 [1] : vector<8x1024xf32> to vector<8xf32>
    %6 = vector.shape_cast %5 : vector<8xf32> to vector<8x1xf32>
    %7 = arith.addf %0, %6 : vector<8x1xf32>
    %c0_4 = arith.constant 0 : index
    %c1024 = arith.constant 1024 : index
    %8 = vector.load %arg1[%c0_4, %c1024] : memref<8x7647xf32, #tpu.memory_space<vmem>>, vector<8x1024xf32>
    %c0_5 = arith.constant 0 : index
    %c1024_6 = arith.constant 1024 : index
    %9 = vector.load %arg2[%c0_5, %c1024_6] : memref<1x7647xf32, #tpu.memory_space<vmem>>, vector<1x1024xf32>
    %10 = vector.broadcast %9 : vector<1x1024xf32> to vector<8x1024xf32>
    %11 = arith.mulf %8, %10 : vector<8x1024xf32>
    %cst_7 = arith.constant dense<0.000000e+00> : vector<8xf32>
    %12 = vector.multi_reduction <add>, %11, %cst_7 [1] : vector<8x1024xf32> to vector<8xf32>
    %13 = vector.shape_cast %12 : vector<8xf32> to vector<8x1xf32>
    %14 = arith.addf %7, %13 : vector<8x1xf32>
    %c0_8 = arith.constant 0 : index
    %c2048 = arith.constant 2048 : index
    %15 = vector.load %arg1[%c0_8, %c2048] : memref<8x7647xf32, #tpu.memory_space<vmem>>, vector<8x1024xf32>
    %c0_9 = arith.constant 0 : index
    %c2048_10 = arith.constant 2048 : index
    %16 = vector.load %arg2[%c0_9, %c2048_10] : memref<1x7647xf32, #tpu.memory_space<vmem>>, vector<1x1024xf32>
    %17 = vector.broadcast %16 : vector<1x1024xf32> to vector<8x1024xf32>
    %18 = arith.mulf %15, %17 : vector<8x1024xf32>
    %cst_11 = arith.constant dense<0.000000e+00> : vector<8xf32>
    %19 = vector.multi_reduction <add>, %18, %cst_11 [1] : vector<8x1024xf32> to vector<8xf32>
    %20 = vector.shape_cast %19 : vector<8xf32> to vector<8x1xf32>
    %21 = arith.addf %14, %20 : vector<8x1xf32>
    %c0_12 = arith.constant 0 : index
    %c3072 = arith.constant 3072 : index
    %22 = vector.load %arg1[%c0_12, %c3072] : memref<8x7647xf32, #tpu.memory_space<vmem>>, vector<8x1024xf32>
    %c0_13 = arith.constant 0 : index
    %c3072_14 = arith.constant 3072 : index
    %23 = vector.load %arg2[%c0_13, %c3072_14] : memref<1x7647xf32, #tpu.memory_space<vmem>>, vector<1x1024xf32>
    %24 = vector.broadcast %23 : vector<1x1024xf32> to vector<8x1024xf32>
    %25 = arith.mulf %22, %24 : vector<8x1024xf32>
    %cst_15 = arith.constant dense<0.000000e+00> : vector<8xf32>
    %26 = vector.multi_reduction <add>, %25, %cst_15 [1] : vector<8x1024xf32> to vector<8xf32>
    %27 = vector.shape_cast %26 : vector<8xf32> to vector<8x1xf32>
    %28 = arith.addf %21, %27 : vector<8x1xf32>
    %c0_16 = arith.constant 0 : index
    %c4096 = arith.constant 4096 : index
    %29 = vector.load %arg1[%c0_16, %c4096] : memref<8x7647xf32, #tpu.memory_space<vmem>>, vector<8x1024xf32>
    %c0_17 = arith.constant 0 : index
    %c4096_18 = arith.constant 4096 : index
    %30 = vector.load %arg2[%c0_17, %c4096_18] : memref<1x7647xf32, #tpu.memory_space<vmem>>, vector<1x1024xf32>
    %31 = vector.broadcast %30 : vector<1x1024xf32> to vector<8x1024xf32>
    %32 = arith.mulf %29, %31 : vector<8x1024xf32>
    %cst_19 = arith.constant dense<0.000000e+00> : vector<8xf32>
    %33 = vector.multi_reduction <add>, %32, %cst_19 [1] : vector<8x1024xf32> to vector<8xf32>
    %34 = vector.shape_cast %33 : vector<8xf32> to vector<8x1xf32>
    %35 = arith.addf %28, %34 : vector<8x1xf32>
    %c0_20 = arith.constant 0 : index
    %c5120 = arith.constant 5120 : index
    %36 = vector.load %arg1[%c0_20, %c5120] : memref<8x7647xf32, #tpu.memory_space<vmem>>, vector<8x1024xf32>
    %c0_21 = arith.constant 0 : index
    %c5120_22 = arith.constant 5120 : index
    %37 = vector.load %arg2[%c0_21, %c5120_22] : memref<1x7647xf32, #tpu.memory_space<vmem>>, vector<1x1024xf32>
    %38 = vector.broadcast %37 : vector<1x1024xf32> to vector<8x1024xf32>
    %39 = arith.mulf %36, %38 : vector<8x1024xf32>
    %cst_23 = arith.constant dense<0.000000e+00> : vector<8xf32>
    %40 = vector.multi_reduction <add>, %39, %cst_23 [1] : vector<8x1024xf32> to vector<8xf32>
    %41 = vector.shape_cast %40 : vector<8xf32> to vector<8x1xf32>
    %42 = arith.addf %35, %41 : vector<8x1xf32>
    %c0_24 = arith.constant 0 : index
    %c6144 = arith.constant 6144 : index
    %43 = vector.load %arg1[%c0_24, %c6144] : memref<8x7647xf32, #tpu.memory_space<vmem>>, vector<8x1024xf32>
    %c0_25 = arith.constant 0 : index
    %c6144_26 = arith.constant 6144 : index
    %44 = vector.load %arg2[%c0_25, %c6144_26] : memref<1x7647xf32, #tpu.memory_space<vmem>>, vector<1x1024xf32>
    %45 = vector.broadcast %44 : vector<1x1024xf32> to vector<8x1024xf32>
    %46 = arith.mulf %43, %45 : vector<8x1024xf32>
    %cst_27 = arith.constant dense<0.000000e+00> : vector<8xf32>
    %47 = vector.multi_reduction <add>, %46, %cst_27 [1] : vector<8x1024xf32> to vector<8xf32>
    %48 = vector.shape_cast %47 : vector<8xf32> to vector<8x1xf32>
    %49 = arith.addf %42, %48 : vector<8x1xf32>
    %c0_28 = arith.constant 0 : index
    %c7168 = arith.constant 7168 : index
    %50 = vector.load %arg1[%c0_28, %c7168] : memref<8x7647xf32, #tpu.memory_space<vmem>>, vector<8x479xf32>
    %c0_29 = arith.constant 0 : index
    %c7168_30 = arith.constant 7168 : index
    %51 = vector.load %arg2[%c0_29, %c7168_30] : memref<1x7647xf32, #tpu.memory_space<vmem>>, vector<1x479xf32>
    %52 = vector.broadcast %51 : vector<1x479xf32> to vector<8x479xf32>
    %53 = arith.mulf %50, %52 : vector<8x479xf32>
    %cst_31 = arith.constant dense<0.000000e+00> : vector<8xf32>
    %54 = vector.multi_reduction <add>, %53, %cst_31 [1] : vector<8x479xf32> to vector<8xf32>
    %55 = vector.shape_cast %54 : vector<8xf32> to vector<8x1xf32>
    %56 = arith.addf %49, %55 : vector<8x1xf32>
    %c0_32 = arith.constant 0 : index
    %c0_33 = arith.constant 0 : index
    %57 = memref.load %arg3[%c0_32, %c0_33] : memref<1x1xf32, #tpu.memory_space<smem>>
    %58 = vector.broadcast %57 : f32 to vector<8x1xf32>
    %59 = arith.addf %56, %58 : vector<8x1xf32>
    %60 = arith.negf %59 : vector<8x1xf32>
    %61 = math.exp %60 : vector<8x1xf32>
    %cst_34 = arith.constant 1.000000e+00 : f32
    %62 = vector.broadcast %cst_34 : f32 to vector<8x1xf32>
    %63 = arith.addf %62, %61 : vector<8x1xf32>
    %64 = arith.divf %62, %63 : vector<8x1xf32>
    %c0_35 = arith.constant 0 : index
    %c0_36 = arith.constant 0 : index
    %65 = vector.load %arg4[%c0_35, %c0_36] : memref<8x1xf32, #tpu.memory_space<vmem>>, vector<8x1xf32>
    tpu.vector_store %arg4[%c0_35, %c0_36], %64 {strides = array<i32>} : memref<8x1xf32, #tpu.memory_space<vmem>>, vector<8x1xf32>,
    return
  }
  func.func @transform_0(%arg0: i32) -> (i32, i32) {
    %c0_i32 = arith.constant 0 : i32
    %c0_i32_0 = arith.constant 0 : i32
    return %arg0, %c0_i32 : i32, i32
  }
  func.func @transform_1(%arg0: i32) -> (i32, i32) {
    %c0_i32 = arith.constant 0 : i32
    %c0_i32_0 = arith.constant 0 : i32
    %c0_i32_1 = arith.constant 0 : i32
    return %c0_i32, %c0_i32_0 : i32, i32
  }
  func.func @transform_2(%arg0: i32) -> (i32, i32) {
    %c0_i32 = arith.constant 0 : i32
    %c0_i32_0 = arith.constant 0 : i32
    %c0_i32_1 = arith.constant 0 : i32
    return %c0_i32, %c0_i32_0 : i32, i32
  }
  func.func @transform_3(%arg0: i32) -> (i32, i32) {
    %c0_i32 = arith.constant 0 : i32
    %c0_i32_0 = arith.constant 0 : i32
    return %arg0, %c0_i32 : i32, i32
  }
}

</mosaic_0001>

<bundles_post_ra>
// kernel: bow_forward.1
= control target key start
LH: loop header
LB: loop body
LE: loop exit
PB: predicated region body
PF: predicated region fallthrough
CT: control target
= control target key end

     0   :  { %s1303_s0 = inlined_call_operand.hbm [shape: f32[10,7647], index: 0, kind: input, shape index: {}]   ;;  %s1304_s1 = inlined_call_operand.hbm [shape: f32[1,7647], index: 1, kind: input, shape index: {}]   ;;  %s1305_s2 = inlined_call_operand.<no memory space> [shape: f32[1,1], index: 2, kind: input, shape index: {}]   ;;  %s1306_s3 = inlined_call_operand.vmem [shape: f32[10,1], index: 3, kind: output, shape index: {}]  }
   0x1   :  { %8 = sst [smem:[#allocation2]] %s1305_s2 }
   0x2   :  { %9 = vsyncpa [#allocation4], 0 }
   0x3   :  { %11 = vsyncpa [#allocation4 + $0x1], 0 }
   0x4   :  { %12 = vsyncpa [#allocation6], 0  ;;  %s988_s14 = smov 0   ;;  %s990_s15 = smov 0  }
   0x5   :  { %s992_s16 = smov 0   ;;  %s994_s17 = smov 0  }
   0x6 LB: > { %s1007_s2 = sadd.s32 4294967295, %s961_s17   ;;  %p38_p0 = scmp.ne.s32.totalorder %s953_s15, %s949_s14  ;;  %s961_s17 = sphi %s994_s17, %s1322_s17   ;;  %s957_s16 = sphi %s992_s16, %s1321_s16   ;;  %s953_s15 = sphi %s990_s15, %s1320_s15   ;;  %s949_s14 = sphi %s988_s14, %s1319_s14  }
   0x7   : > { %p1307_p1 = scmp.eq.s32.totalorder %s1007_s2, 0  ;;  %p802_p2 = scmp.ge.s32.totalorder %s961_s17, 1 }
   0x8   : > { %p117_p3 = scmp.lt.s32.totalorder %s961_s17, 3  ;;  %s963_s20 = smov [#allocation5]  }
   0x9   : > { %p1015_p4 = por %p1307_p1, %p38_p0  ;;  %s130_s21 = sshll.u32 %s963_s20, 4  ;;  %s131_s21 = int_to_ptr.vmem [resolvable:$true] %s130_s21 }
   0xa   : > { %p1019_p5 = pnand %p802_p2, %p117_p3  ;;  %s1026_s22 = sadd.s32 1, %s961_s17  }
   0xb   : > { %s1310_s18 = scalar_select %p1015_p4, 1, 0 }
   0xc   : > { %s1311_s19 = scalar_select %p1019_p5, 1, 0 }
   0xd   : > { %p821_p6 = pneg %p1019_p5  ;;  %s22_s24 = ssub.s32 %s961_s17, %s1026_s22 }
   0xe   : > { %p1036_p8 = scmp.eq.s32.totalorder %s22_s24, 0  ;;  %s25_s26 = sadd.s32 1, %s957_s16 }
   0xf   : > { %p1030_p7 = pnand %p821_p6, %p1307_p1  ;;  %p32_p9 = scmp.ne.s32.totalorder %s957_s16, %s953_s15 }
  0x10   : > { %s880_s27 = scalar_lea.vmem %s131_s21, 960  ;;  %p888_p0 = scmp.lt.s32.totalorder %s131_s21, %s131_s21 }
  0x11   : > { %p871_p10 = pneg %p1030_p7  ;;  %p881_p11 = scmp.ne.s32.totalorder %s131_s21, %s880_s27 }
  0x12   : > { %p889_p2 = scmp.lt.s32.totalorder %s880_s27, %s880_s27 }
  0x13   : > { %p883_p12 = pnand %p881_p11, %p871_p10 }
  0x14   : > { %p890_p3 = por %p889_p2, %p888_p0 }
  0x15   : > { %p884_p13 = pneg %p883_p12 }
  0x17   : > { %p891_p6 = pnand %p890_p3, %p884_p13 }
  0x19   : > { %894 = shalt.err (!%p891_p6)
}
  0x1a   : > { %824 = dma.hbm_to_vmem [thread:$0]  (!%p1030_p7), %s1304_s1, 960, %s131_s21, [#allocation6]  }
  0x1b   : > { %s1053_s30 = scalar_select %p1036_p8, %s957_s16, %s25_s26  }
  0x1c   : > { %p33_p10 = scmp.eq.s32.totalorder %s961_s17, 0  ;;  %p830_p11 = scmp.lt.s32.totalorder %s961_s17, 2 }
  0x1d   : > { %s144_s4 = sand.u32 1, %s957_s16   ;;  %s813_s5 = smul.u32 7680, %s961_s17 }
  0x1e   : > { %p34_p12 = por %p33_p10, %p32_p9  ;;  %s812_s6 = smul.u32 480, %s144_s4 }
  0x1f   : > { %s1069_s10 = scalar_lea.hbm %s1303_s0, %s813_s5  ;;  %s145_s13 = scalar_lea.sflag [#allocation4], %s144_s4 }
  0x20   : > { %p1062_p13 = pnand %p830_p11, %p34_p12  ;;  %s148_s11 = scalar_lea.vmem [#allocation3], %s812_s6 }
  0x21   : > { %s156_s12 = sshll.u32 %s148_s11, 4  ;;  %s895_s14 = scalar_lea.hbm %s1069_s10, 7680  ;;  %s157_s12 = int_to_ptr.vmem [resolvable:$true] %s156_s12 }
  0x22   : > { %p896_p7 = scmp.ne.s32.totalorder %s1069_s10, %s895_s14  ;;  %p897_p8 = pneg %p1062_p13 }
  0x23   : > { %s900_s21 = scalar_lea.hbm %s1303_s0, 15360  ;;  %p901_p2 = scmp.lt.s32.totalorder %s1069_s10, %s1303_s0 }
  0x24   : > { %p898_p9 = pnand %p897_p8, %p896_p7  ;;  %p902_p3 = scmp.lt.s32.totalorder %s900_s21, %s895_s14 }
  0x26   : > { %p899_p0 = pneg %p898_p9  ;;  %p903_p6 = por %p902_p3, %p901_p2 }
  0x28   : > { %p904_p10 = pnand %p903_p6, %p899_p0 }
  0x2a   : > { %907 = shalt.err (!%p904_p10)
}
  0x2b   : > { %s908_s25 = scalar_lea.vmem %s157_s12, 7680  ;;  %s964_s26 = smov [#allocation3]  }
  0x2c   : > { %p909_p11 = scmp.ne.s32.totalorder %s157_s12, %s908_s25  ;;  %s913_s27 = sshll.u32 %s964_s26, 4  ;;  %s914_s27 = int_to_ptr.vmem [resolvable:$false] %s913_s27 }
  0x2d   : > { %s915_s28 = scalar_lea.vmem %s914_s27, 15360  ;;  %p916_p7 = scmp.lt.s32.totalorder %s157_s12, %s914_s27 }
  0x2e   : > { %p911_p12 = pnand %p909_p11, %p897_p8  ;;  %p917_p9 = scmp.lt.s32.totalorder %s915_s28, %s908_s25 }
  0x30   : > { %p912_p1 = pneg %p911_p12  ;;  %p918_p4 = por %p917_p9, %p916_p7 }
  0x32   : > { %p919_p5 = pnand %p918_p4, %p912_p1 }
  0x34   : > { %922 = shalt.err (!%p919_p5)
}
  0x35   : > { %828 = dma.hbm_to_vmem [thread:$0]  (!%p1062_p13), %s1069_s10, 7680, %s157_s12, %s145_s13  }
  0x36   : > { %p1315_p0 = scmp.ne.s32.totalorder %s1311_s19, 0 }
  0x37   : > { %s167_s29 = sand.u32 (!%p1315_p0), 1, %s953_s15   ;;  %p1316_p8 = scmp.ne.s32.totalorder (!%p1315_p0), %s1310_s18, 0 }
  0x38   : > { %165 = sbr.rel (%p1315_p0) target bundleno = 298 (0x12a), region = 32  ;;  %s168_s5 = scalar_lea.sflag (!%p1315_p0), [#allocation4], %s167_s29 }
  0x39   : > { %s814_s4 = smul.u32 (!%p1315_p0), 480, %s167_s29 }
  0x3b   : > { %s1088_s6 = scalar_lea.vmem (!%p1315_p0), [#allocation3], %s814_s4 }
  0x3d   : > { %940 = dma.done.wait (%p1316_p8), %s168_s5, 7680  }
  0x3e   : > { %942 = vsyncadd (%p1316_p8), %s168_s5, 4294959616  ;;  %p1317_p1 = scmp.eq.s32.totalorder %s1007_s2, 0 }
  0x40   : > { %944 = dma.done.wait (%p1317_p1), [#allocation6], 960   ;;  %p1318_p4 = pmov %p1317_p1 }
  0x41   : > { %v211_v0 = vlaneseq  ;;  %v201_v8 = vld [vmem:[%s1088_s6] sm:$0xff]  ;;  %v202_v9 = vld [vmem:[%s1088_s6 + $0x8] sm:$0xff]  ;;  %v203_v10 = vld [vmem:[%s1088_s6 + $0x10] sm:$0xff]  ;;  %vm709_vm0 = vcmask 777216   ;;  %s715_s18 = sld [smem:[#allocation2]]  ;;  %p197_p5 = scmp.lt.s32.totalorder %s1007_s2, 1 }
  0x42   : > { %946 = vsyncadd (%p1318_p4), [#allocation6], 4294966336  ;;  %v209_v11 = vld [vmem:[#allocation5] sm:$0xff]  ;;  %v204_v14 = vld [vmem:[%s1088_s6 + $0x18] sm:$0xff]  ;;  %vm724_vm1 = vcmask 7168  }
  0x43   : > { %v212_v1 = vshrl.u32 %v211_v0, 7  ;;  %v205_v21 = vld [vmem:[%s1088_s6 + $0x20] sm:$0xff]  ;;  %v206_v22 = vld [vmem:[%s1088_s6 + $0x28] sm:$0xff]  ;;  %v345_v26 = vld [vmem:[#allocation5 + $0x10] sm:$0xff]  ;;  %s1324_s2 = smov (!%p197_p5, %s1007_s2), 1 }
  0x44   : > { %v337_v30 = vld [vmem:[%s1088_s6 + $0x80] sm:$0xff]  ;;  %v338_v31 = vld [vmem:[%s1088_s6 + $0x88] sm:$0xff]  ;;  %v207_v32 = vld [vmem:[%s1088_s6 + $0x30] sm:$0xff]  ;;  %s808_s19 = sshll.u32 %s1324_s2, 3 }
  0x45   : > { %v1098_v2 = vsub.s32 0, %v212_v1  ;;  %v1100_v3 = vsub.s32 1, %v212_v1  ;;  %v1102_v4 = vsub.s32 2, %v212_v1  ;;  %v1104_v5 = vsub.s32 3, %v212_v1  ;;  %v208_v33 = vld [vmem:[%s1088_s6 + $0x38] sm:$0xff]  ;;  %v339_v35 = vld [vmem:[%s1088_s6 + $0x90] sm:$0xff]  ;;  %s200_s9 = scalar_lea.vmem %s1306_s3, %s808_s19 }
  0x46   : > { %v1106_v6 = vsub.s32 4, %v212_v1  ;;  %v1108_v7 = vsub.s32 5, %v212_v1  ;;  %v1113_v12 = vsub.s32 6, %v212_v1  ;;  %v1115_v13 = vsub.s32 7, %v212_v1  ;;  %v340_v41 = vld [vmem:[%s1088_s6 + $0x98] sm:$0xff]  ;;  %v1140_v48 = vld [vmem:[#allocation5 + $0x8] sm:$0xff] }
  0x47   : > { %v214_v15 = vrot.slane %v209_v11, %v1098_v2  ;;  %v218_v16 = vrot.slane %v209_v11, %v1100_v3  ;;  %v222_v17 = vrot.slane %v209_v11, %v1102_v4  ;;  %v226_v18 = vrot.slane %v209_v11, %v1104_v5  ;;  %v341_v51 = vld [vmem:[%s1088_s6 + $0xa0] sm:$0xff]  ;;  %v342_v52 = vld [vmem:[%s1088_s6 + $0xa8] sm:$0xff]  ;;  %v343_v56 = vld [vmem:[%s1088_s6 + $0xb0] sm:$0xff] }
  0x48   : > { %v230_v19 = vrot.slane %v209_v11, %v1106_v6  ;;  %v234_v20 = vrot.slane %v209_v11, %v1108_v7  ;;  %v238_v27 = vrot.slane %v209_v11, %v1113_v12  ;;  %v242_v28 = vrot.slane %v209_v11, %v1115_v13  ;;  %v269_v60 = vld [vmem:[%s1088_s6 + $0x40] sm:$0xff]  ;;  %v270_v61 = vld [vmem:[%s1088_s6 + $0x48] sm:$0xff]  ;;  %v271_v62 = vld [vmem:[%s1088_s6 + $0x50] sm:$0xff] }
  0x49   : > { %v251_v23 = vmul.f32 %v214_v15, %v201_v8  ;;  %v252_v24 = vmul.f32 %v218_v16, %v202_v9  ;;  %v253_v25 = vmul.f32 %v222_v17, %v203_v10  ;;  %v254_v29 = vmul.f32 %v226_v18, %v204_v14  ;;  %v344_v10 = vld [vmem:[%s1088_s6 + $0xb8] sm:$0xff] }
  0x4a   : > { %v350_v36 = vrot.slane %v345_v26, %v1098_v2  ;;  %v354_v37 = vrot.slane %v345_v26, %v1100_v3  ;;  %v358_v38 = vrot.slane %v345_v26, %v1102_v4  ;;  %v255_v39 = vmul.f32 %v230_v19, %v205_v21  ;;  %v272_v16 = vld [vmem:[%s1088_s6 + $0x58] sm:$0xff] }
  0x4b   : > { %v259_v34 = vadd.f32 %v252_v24, %v251_v23  ;;  %v256_v40 = vmul.f32 %v234_v20, %v206_v22  ;;  %v362_v42 = vrot.slane %v345_v26, %v1104_v5  ;;  %v366_v43 = vrot.slane %v345_v26, %v1106_v6  ;;  %v1162_v21 = vld [vmem:[#allocation5 + $0x18] sm:$0xff]  ;;  %v273_v24 = vld [vmem:[%s1088_s6 + $0x60] sm:$0xff] }
  0x4c   : > { %v370_v45 = vrot.slane %v345_v26, %v1108_v7  ;;  %v387_v46 = vmul.f32 %v350_v36, %v337_v30  ;;  %v388_v47 = vmul.f32 %v354_v37, %v338_v31  ;;  %v257_v49 = vmul.f32 %v238_v27, %v207_v32  ;;  %v406_v36 = vld [vmem:[%s1088_s6 + $0xc8] sm:$0xff] }
  0x4d   : > { %v260_v44 = vadd.f32 %v259_v34, %v253_v25  ;;  %v258_v50 = vmul.f32 %v242_v28, %v208_v33  ;;  %v374_v53 = vrot.slane %v345_v26, %v1113_v12  ;;  %v389_v54 = vmul.f32 %v358_v38, %v339_v35  ;;  %v274_v28 = vld [vmem:[%s1088_s6 + $0x68] sm:$0xff]  ;;  %v405_v35 = vld [vmem:[%s1088_s6 + $0xc0] sm:$0xff] }
  0x4e   : > { %v378_v57 = vrot.slane %v345_v26, %v1115_v13  ;;  %v390_v58 = vmul.f32 %v362_v42, %v340_v41  ;;  %v395_v59 = vadd.f32 %v388_v47, %v387_v46  ;;  %v282_v63 = vrot.slane %v1140_v48, %v1098_v2  ;;  %v276_v46 = vld [vmem:[%s1088_s6 + $0x78] sm:$0xff] }
  0x4f   : > { %v261_v55 = vadd.f32 %v260_v44, %v254_v29  ;;  %v286_v0 = vrot.slane %v1140_v48, %v1100_v3  ;;  %v290_v1 = vrot.slane %v1140_v48, %v1102_v4  ;;  %v294_v8 = vrot.slane %v1140_v48, %v1104_v5 }
  0x50   : > { %v391_v11 = vmul.f32 %v366_v43, %v341_v51  ;;  %v392_v14 = vmul.f32 %v370_v45, %v342_v52  ;;  %v396_v15 = vadd.f32 %v395_v59, %v389_v54  ;;  %v393_v17 = vmul.f32 %v374_v53, %v343_v56  ;;  %v275_v45 = vld [vmem:[%s1088_s6 + $0x70] sm:$0xff] }
  0x51   : > { %v262_v9 = vadd.f32 %v261_v55, %v255_v39  ;;  %v298_v18 = vrot.slane %v1140_v48, %v1106_v6  ;;  %v319_v19 = vmul.f32 %v282_v63, %v269_v60  ;;  %v320_v20 = vmul.f32 %v286_v0, %v270_v61  ;;  %v407_v39 = vld [vmem:[%s1088_s6 + $0xd0] sm:$0xff]  ;;  %v1190_v55 = vld [vmem:[#allocation5 + $0x20] sm:$0xff] }
  0x52   : > { %v397_v23 = vadd.f32 %v396_v15, %v390_v58  ;;  %v302_v25 = vrot.slane %v1140_v48, %v1108_v7  ;;  %v321_v26 = vmul.f32 %v290_v1, %v271_v62  ;;  %v394_v27 = vmul.f32 %v378_v57, %v344_v10  ;;  %v409_v57 = vld [vmem:[%s1088_s6 + $0xe0] sm:$0xff]  ;;  %v410_v62 = vld [vmem:[%s1088_s6 + $0xe8] sm:$0xff]  ;;  %v411_v63 = vld [vmem:[%s1088_s6 + $0xf0] sm:$0xff] }
  0x53   : > { %v263_v22 = vadd.f32 %v262_v9, %v256_v40  ;;  %v306_v29 = vrot.slane %v1140_v48, %v1113_v12  ;;  %v310_v30 = vrot.slane %v1140_v48, %v1115_v13  ;;  %v322_v31 = vmul.f32 %v294_v8, %v272_v16  ;;  %v475_v15 = vld [vmem:[%s1088_s6 + $0x110] sm:$0xff] }
  0x54   : > { %v398_v33 = vadd.f32 %v397_v23, %v391_v11  ;;  %v327_v34 = vadd.f32 %v320_v20, %v319_v19  ;;  %v418_v37 = vrot.slane %v1162_v21, %v1098_v2  ;;  %v323_v38 = vmul.f32 %v298_v18, %v273_v24  ;;  %v473_v11 = vld [vmem:[%s1088_s6 + $0x100] sm:$0xff] }
  0x55   : > { %v264_v32 = vadd.f32 %v263_v22, %v257_v49  ;;  %v422_v40 = vrot.slane %v1162_v21, %v1100_v3  ;;  %v426_v41 = vrot.slane %v1162_v21, %v1102_v4  ;;  %v430_v42 = vrot.slane %v1162_v21, %v1104_v5  ;;  %v408_v49 = vld [vmem:[%s1088_s6 + $0xd8] sm:$0xff] }
  0x56   : > { %v399_v44 = vadd.f32 %v398_v33, %v392_v14  ;;  %v324_v47 = vmul.f32 %v302_v25, %v274_v28  ;;  %v328_v48 = vadd.f32 %v327_v34, %v321_v26  ;;  %v434_v51 = vrot.slane %v1162_v21, %v1106_v6  ;;  %v474_v14 = vld [vmem:[%s1088_s6 + $0x108] sm:$0xff]  ;;  %v412_v22 = vld [vmem:[%s1088_s6 + $0xf8] sm:$0xff]  ;;  %v477_v34 = vld [vmem:[%s1088_s6 + $0x120] sm:$0xff] }
  0x57   : > { %v265_v43 = vadd.f32 %v264_v32, %v258_v50  ;;  %v438_v52 = vrot.slane %v1162_v21, %v1108_v7  ;;  %v455_v53 = vmul.f32 %v418_v37, %v405_v35  ;;  %v456_v54 = vmul.f32 %v422_v40, %v406_v36  ;;  %v476_v26 = vld [vmem:[%s1088_s6 + $0x118] sm:$0xff] }
  0x58   : > { %v400_v50 = vadd.f32 %v399_v44, %v393_v17  ;;  %v329_v56 = vadd.f32 %v328_v48, %v322_v31  ;;  %v442_v58 = vrot.slane %v1162_v21, %v1113_v12  ;;  %v457_v59 = vmul.f32 %v426_v41, %v407_v39  ;;  %v1214_v31 = vld [vmem:[#allocation5 + $0x28] sm:$0xff]  ;;  %v479_v39 = vld [vmem:[%s1088_s6 + $0x130] sm:$0xff] }
  0x59   : > { %266 = vadd.xlane.f32.xlu0 %v265_v43  ;;  %v325_v60 = vmul.f32 %v306_v29, %v275_v45  ;;  %v326_v61 = vmul.f32 %v310_v30, %v276_v46  ;;  %v446_v0 = vrot.slane %v1162_v21, %v1115_v13  ;;  %v458_v1 = vmul.f32 %v430_v42, %v408_v49  ;;  %v541_v45 = vld [vmem:[%s1088_s6 + $0x140] sm:$0xff]  ;;  %v542_v46 = vld [vmem:[%s1088_s6 + $0x148] sm:$0xff] }
  0x5a   : > { %v401_v8 = vadd.f32 %v400_v50, %v394_v27  ;;  %v330_v9 = vadd.f32 %v329_v56, %v323_v38  ;;  %v463_v10 = vadd.f32 %v456_v54, %v455_v53  ;;  %v486_v16 = vrot.slane %v1190_v55, %v1098_v2  ;;  %v478_v38 = vld [vmem:[%s1088_s6 + $0x128] sm:$0xff] }
  0x5b   : > { %v459_v17 = vmul.f32 %v434_v51, %v409_v57  ;;  %v490_v18 = vrot.slane %v1190_v55, %v1100_v3  ;;  %v494_v19 = vrot.slane %v1190_v55, %v1102_v4  ;;  %v498_v20 = vrot.slane %v1190_v55, %v1104_v5  ;;  %v480_v51 = vld [vmem:[%s1088_s6 + $0x138] sm:$0xff] }
  0x5c   : > { %402 = vadd.xlane.f32.xlu1 %v401_v8  ;;  %v331_v21 = vadd.f32 %v330_v9, %v324_v47  ;;  %v460_v23 = vmul.f32 %v438_v52, %v410_v62  ;;  %v461_v24 = vmul.f32 %v442_v58, %v411_v63  ;;  %v464_v25 = vadd.f32 %v463_v10, %v457_v59  ;;  %v543_v47 = vld [vmem:[%s1088_s6 + $0x150] sm:$0xff]  ;;  %v544_v58 = vld [vmem:[%s1088_s6 + $0x158] sm:$0xff]  ;;  %v545_v9 = vld [vmem:[%s1088_s6 + $0x160] sm:$0xff] }
  0x5d   : > { %v502_v27 = vrot.slane %v1190_v55, %v1106_v6  ;;  %v523_v28 = vmul.f32 %v486_v16, %v473_v11  ;;  %v524_v29 = vmul.f32 %v490_v18, %v474_v14  ;;  %v525_v30 = vmul.f32 %v494_v19, %v475_v15  ;;  %v546_v15 = vld [vmem:[%s1088_s6 + $0x168] sm:$0xff]  ;;  %v609_v19 = vld [vmem:[%s1088_s6 + $0x180] sm:$0xff] }
  0x5e   : > { %v332_v32 = vadd.f32 %v331_v21, %v325_v60  ;;  %v465_v33 = vadd.f32 %v464_v25, %v458_v1  ;;  %v506_v35 = vrot.slane %v1190_v55, %v1108_v7  ;;  %v510_v36 = vrot.slane %v1190_v55, %v1113_v12  ;;  %v610_v21 = vld [vmem:[%s1088_s6 + $0x188] sm:$0xff] }
  0x5f   : > { %v462_v37 = vmul.f32 %v446_v0, %v412_v22  ;;  %v514_v40 = vrot.slane %v1190_v55, %v1115_v13  ;;  %v526_v41 = vmul.f32 %v498_v20, %v476_v26  ;;  %v531_v42 = vadd.f32 %v524_v29, %v523_v28  ;;  %v1240_v0 = vld [vmem:[#allocation5 + $0x30] sm:$0xff]  ;;  %v548_v28 = vld [vmem:[%s1088_s6 + $0x178] sm:$0xff] }
  0x60   : > { %v333_v43 = vadd.f32 %v332_v32, %v326_v61  ;;  %v466_v44 = vadd.f32 %v465_v33, %v459_v17  ;;  %v554_v48 = vrot.slane %v1214_v31, %v1098_v2  ;;  %v558_v49 = vrot.slane %v1214_v31, %v1100_v3  ;;  %v611_v22 = vld [vmem:[%s1088_s6 + $0x190] sm:$0xff]  ;;  %v612_v33 = vld [vmem:[%s1088_s6 + $0x198] sm:$0xff] }
  0x61   : > { %v527_v52 = vmul.f32 %v502_v27, %v477_v34  ;;  %v532_v53 = vadd.f32 %v531_v42, %v525_v30  ;;  %v562_v54 = vrot.slane %v1214_v31, %v1102_v4  ;;  %v566_v55 = vrot.slane %v1214_v31, %v1104_v5  ;;  %v547_v27 = vld [vmem:[%s1088_s6 + $0x170] sm:$0xff] }
  0x62   : > { %334 = vadd.xlane.f32.xlu0 %v333_v43  ;;  %v467_v50 = vadd.f32 %v466_v44, %v460_v23  ;;  %v528_v56 = vmul.f32 %v506_v35, %v478_v38  ;;  %v529_v57 = vmul.f32 %v510_v36, %v479_v39  ;;  %v570_v59 = vrot.slane %v1214_v31, %v1106_v6  ;;  %v613_v43 = vld [vmem:[%s1088_s6 + $0x1a0] sm:$0xff] }
  0x63   : > { %v533_v60 = vadd.f32 %v532_v53, %v526_v41  ;;  %v591_v61 = vmul.f32 %v554_v48, %v541_v45  ;;  %v592_v62 = vmul.f32 %v558_v49, %v542_v46  ;;  %v593_v63 = vmul.f32 %v562_v54, %v543_v47  ;;  %v677_v45 = vld [vmem:[%s1088_s6 + $0x1c0] sm:$0xff]  ;;  %v678_v49 = vld [vmem:[%s1088_s6 + $0x1c8] sm:$0xff] }
  0x64   : > { %v468_v1 = vadd.f32 %v467_v50, %v461_v24  ;;  %v530_v8 = vmul.f32 %v514_v40, %v480_v51  ;;  %v574_v10 = vrot.slane %v1214_v31, %v1108_v7  ;;  %v578_v11 = vrot.slane %v1214_v31, %v1113_v12  ;;  %v681_v40 = vld [vmem:[#allocation5 + $0x38] sm:$0xf]  ;;  %v679_v51 = vld [vmem:[%s1088_s6 + $0x1d0] sm:$0xff]  ;;  %v614_v53 = vld [vmem:[%s1088_s6 + $0x1a8] sm:$0xff] }
  0x65   : > { %v534_v14 = vadd.f32 %v533_v60, %v527_v52  ;;  %v582_v16 = vrot.slane %v1214_v31, %v1115_v13  ;;  %v594_v17 = vmul.f32 %v566_v55, %v544_v58  ;;  %v599_v18 = vadd.f32 %v592_v62, %v591_v61  ;;  %v680_v52 = vld [vmem:[%s1088_s6 + $0x1d8] sm:$0xff]  ;;  %v615_v60 = vld [vmem:[%s1088_s6 + $0x1b0] sm:$0xff] }
  0x66   : > { %v469_v20 = vadd.f32 %v468_v1, %v462_v37  ;;  %v622_v23 = vrot.slane %v1240_v0, %v1098_v2  ;;  %v626_v24 = vrot.slane %v1240_v0, %v1100_v3  ;;  %v630_v25 = vrot.slane %v1240_v0, %v1102_v4 }
  0x67   : > { %v535_v26 = vadd.f32 %v534_v14, %v528_v56  ;;  %v595_v29 = vmul.f32 %v570_v59, %v545_v9  ;;  %v600_v30 = vadd.f32 %v599_v18, %v593_v63  ;;  %v634_v31 = vrot.slane %v1240_v0, %v1104_v5  ;;  %v616_v9 = vld [vmem:[%s1088_s6 + $0x1b8] sm:$0xff] }
  0x68   : > { %470 = vadd.xlane.f32.xlu1 %v469_v20  ;;  %v596_v32 = vmul.f32 %v574_v10, %v546_v15  ;;  %v638_v34 = vrot.slane %v1240_v0, %v1106_v6  ;;  %v659_v35 = vmul.f32 %v622_v23, %v609_v19  ;;  %v660_v38 = vmul.f32 %v626_v24, %v610_v21 }
  0x69   : > { %v536_v36 = vadd.f32 %v535_v26, %v529_v57  ;;  %v601_v37 = vadd.f32 %v600_v30, %v594_v17  ;;  %v661_v39 = vmul.f32 %v630_v25, %v611_v22  ;;  %v597_v41 = vmul.f32 %v578_v11, %v547_v27 }
  0x6a   : > { %v598_v42 = vmul.f32 %v582_v16, %v548_v28  ;;  %v642_v44 = vrot.slane %v1240_v0, %v1108_v7  ;;  %v662_v47 = vmul.f32 %v634_v31, %v612_v33  ;;  %v667_v48 = vadd.f32 %v660_v38, %v659_v35 }
  0x6b   : > { %v537_v46 = vadd.f32 %v536_v36, %v530_v8  ;;  %v602_v6 = vadd.f32 %v601_v37, %v595_v29  ;;  %v686_v54 = vrot.slane %v681_v40, %v1098_v2  ;;  %v690_v55 = vrot.slane %v681_v40, %v1100_v3 }
  0x6c   : > { %v694_v50 = vrot.slane %v681_v40, %v1102_v4  ;;  %v698_v7 = vrot.slane %v681_v40, %v1104_v5  ;;  %v646_v57 = vrot.slane %v1240_v0, %v1113_v12  ;;  %v663_v58 = vmul.f32 %v638_v34, %v613_v43 }
  0x6d   : > { %538 = vadd.xlane.f32.xlu0 %v537_v46  ;;  %v603_v56 = vadd.f32 %v602_v6, %v596_v32  ;;  %v668_v59 = vadd.f32 %v667_v48, %v661_v39  ;;  %v703_v61 = vmul.f32 %v686_v54, %v677_v45  ;;  %v704_v62 = vmul.f32 %v690_v55, %v678_v49 }
  0x6e   : > { %v705_v63 = vmul.f32 %v694_v50, %v679_v51  ;;  %v706_v1 = vmul.f32 %v698_v7, %v680_v52  ;;  %v650_v3 = vrot.slane %v1240_v0, %v1115_v13  ;;  %v664_v4 = vmul.f32 %v642_v44, %v614_v53 }
  0x6f   : > { %v604_v2 = vadd.f32 %v603_v56, %v597_v41  ;;  %v669_v8 = vadd.f32 %v668_v59, %v662_v47  ;;  %v707_v5 = vadd.f32 %v704_v62, %v703_v61  ;;  %v665_v11 = vmul.f32 %v646_v57, %v615_v60 }
  0x70   : > { %v710_v12 = vsel %vm709_vm0, %v706_v1, 0.0  ;;  %v666_v16 = vmul.f32 %v650_v3, %v616_v9  ;;  %v716_v33 = vstv %s715_s18 }
  0x71   : > { %v605_v10 = vadd.f32 %v604_v2, %v598_v42  ;;  %v670_v14 = vadd.f32 %v669_v8, %v663_v58  ;;  %v708_v15 = vadd.f32 %v707_v5, %v705_v63 }
  0x73   : > { %606 = vadd.xlane.f32.xlu1 %v605_v10  ;;  %v671_v17 = vadd.f32 %v670_v14, %v664_v4  ;;  %v711_v18 = vadd.f32 %v710_v12, %v708_v15 }
  0x75   : > { %v672_v19 = vadd.f32 %v671_v17, %v665_v11 }
  0x77   : > { %v673_v20 = vadd.f32 %v672_v19, %v666_v16  ;;  %712 = vadd.xlane.f32.xlu1 %v711_v18 }
  0x79   : > { %674 = vadd.xlane.f32.xlu0 %v673_v20 }
  0xe2   : > { %v267_v21 = vpop.xlane.xlu0 %266 }
  0xe5   : > { %v403_v0 = vpop.xlane.xlu1 %402 }
  0xeb   : > { %v335_v13 = vpop.xlane.xlu0 %334 }
  0xec   : > { %v336_v22 = vadd.f32 %v335_v13, %v267_v21 }
  0xee   : > { %v404_v23 = vadd.f32 %v403_v0, %v336_v22 }
  0xf1   : > { %v471_v24 = vpop.xlane.xlu1 %470 }
  0xf2   : > { %v472_v25 = vadd.f32 %v471_v24, %v404_v23 }
  0xf6   : > { %v539_v26 = vpop.xlane.xlu0 %538 }
  0xf7   : > { %v540_v27 = vadd.f32 %v539_v26, %v472_v25 }
  0xfc   : > { %v607_v28 = vpop.xlane.xlu1 %606 }
  0xfd   : > { %v608_v29 = vadd.f32 %v607_v28, %v540_v27 }
 0x100   : > { %v713_v31 = vpop.xlane.xlu1 %712 }
 0x102   : > { %v675_v30 = vpop.xlane.xlu0 %674 }
 0x103   : > { %v676_v32 = vadd.f32 %v675_v30, %v608_v29 }
 0x105   : > { %v714_v34 = vadd.f32 %v713_v31, %v676_v32 }
 0x107   : > { %v717_v35 = vadd.f32 %v716_v33, %v714_v34 }
 0x109   : > { %v809_v36 = vmul.f32 -1.442695, %v717_v35 }
 0x10b   : > { %865 = vpow2.f32 %v809_v36 }
 0x118   : > { %v866_v37 = vpop.eup %865 }
 0x119   : > { %v721_v38 = vadd.f32 1.0, %v866_v37 }
 0x11b   : > { %867 = vrcp.f32 %v721_v38 }
 0x128   : > { %v868_v39 = vpop.eup %867 }
 0x129   : > { %725 = vst.msk [vmem:[%s200_s9] sm:$0xff] %vm724_vm1, %v868_v39 }
 0x12a PF: > { %p15_p13 = scmp.ge.s32.totalorder %s1026_s22, 4   ;;  %s1319_s14 = smov %s953_s15 }
 0x12b   : > { %s1320_s15 = smov %s957_s16  ;;  %s1321_s16 = smov %s1053_s30 }
 0x12c   : > { %s1322_s17 = smov %s1026_s22  ;;  %17 = sbr.rel (!%p15_p13) target bundleno = 6 (0x6), region = 76 }
 0x131   :  { %745 = vsyncpa [#allocation4], 1 }
 0x132   :  { %747 = vsyncpa [#allocation4 + $0x1], 1 }
 0x133   :  { %748 = vsyncpa [#allocation6], 1 }

</bundles_post_ra>
